<compile_context>
chip_gen: v5e
topology: v5e:2x2
jax: 0.10.0
libtpu: 0.0.40
codegen_flags: <defaults>
</compile_context>

<pallas_src>
import functools

import jax
import jax.numpy as jnp
from jax.experimental import pallas as pl
from jax.experimental.pallas import tpu as pltpu

NEG_SLOPE = 0.01   # nn.LeakyReLU default
BN_EPS = 1e-5
LANE = 128
SUBLANE = 8
VMEM_LIMIT = 32 * 1024 * 1024


def _round_up(x, m):
    return (x + m - 1) // m * m


# ------------------------- Pallas kernels ---------------------------------

def conv_bias_stats_kernel(p_ref, w_ref, b_ref, y_ref, stats_ref, *, tm, m_total):
    """im2col conv (bf16 MXU, f32 acc) + bias.  Writes the pre-BN output tile
    (bf16) and per-tile (sum, sum-of-squares) f32 partials for BN."""
    y = jnp.dot(p_ref[...], w_ref[...], preferred_element_type=jnp.float32)
    y = y + b_ref[...]                                   # (TM, Npad) + (1, Npad)

    # Stats from the f32 accumulator; rows that are pure M-padding are masked
    # out so the global BN statistics stay exact under any tiling.
    gidx = pl.program_id(0) * tm + jax.lax.broadcasted_iota(jnp.int32, y.shape, 0)
    ym = jnp.where(gidx < m_total, y, 0.0)
    s = jnp.sum(ym, axis=0, keepdims=True)               # (1, Npad)
    sq = jnp.sum(ym * ym, axis=0, keepdims=True)         # (1, Npad)
    row = jax.lax.broadcasted_iota(jnp.int32, (SUBLANE, y.shape[1]), 0)
    stats_ref[0] = jnp.where(row == 0, s, 0.0) + jnp.where(row == 1, sq, 0.0)

    y_ref[...] = y.astype(y_ref.dtype)                   # bf16 intermediate


def bn_apply_lrelu_kernel(y_ref, scale_ref, shift_ref, o_ref):
    """y * scale + shift (BN with precomputed global stats) + LeakyReLU."""
    y = y_ref[...].astype(jnp.float32) * scale_ref[...] + shift_ref[...]
    o_ref[...] = jnp.maximum(y, NEG_SLOPE * y).astype(o_ref.dtype)


def conv_bias_lrelu_kernel(p_ref, w_ref, b_ref, o_ref):
    """im2col conv (bf16 MXU, f32 acc) + bias + LeakyReLU."""
    y = jnp.dot(p_ref[...], w_ref[...], preferred_element_type=jnp.float32)
    y = y + b_ref[...]
    o_ref[...] = jnp.maximum(y, NEG_SLOPE * y)


# ---------------------------- glue helpers ---------------------------------

def _im2col_3x3(x_nhwc, stride):
    """3x3, pad=1 im2col. Returns (B*Ho*Wo, 9*C) patches ordered (kh, kw, c)."""
    B, H, W, C = x_nhwc.shape
    xp = jnp.pad(x_nhwc, ((0, 0), (1, 1), (1, 1), (0, 0)))
    Ho = (H - 1) // stride + 1
    Wo = (W - 1) // stride + 1
    cols = []
    for kh in range(3):
        for kw in range(3):
            cols.append(xp[:, kh:kh + stride * Ho:stride,
                           kw:kw + stride * Wo:stride, :])
    patches = jnp.concatenate(cols, axis=-1)             # (B, Ho, Wo, 9*C)
    return patches.reshape(B * Ho * Wo, 9 * C), Ho, Wo


def _pad2d(a, rows, cols):
    r, c = a.shape
    return jnp.pad(a, ((0, rows - r), (0, cols - c)))


def _tile_m(m, target, min_grid=2):
    """Row tile (multiple of 8).  Keeps >= min_grid grid steps when the
    problem is big enough so dimension_semantics=('parallel',) can split rows
    across both v7x TensorCores; on 1-TC chips the extra step is negligible."""
    m8 = _round_up(max(m, 1), SUBLANE)
    tm = min(_round_up(target, SUBLANE), m8)
    if m8 > SUBLANE:
        tm = min(tm, _round_up(-(-m8 // min_grid), SUBLANE))
    tm = max(tm, SUBLANE)
    mpad = _round_up(m, tm)
    return tm, mpad, mpad // tm


def _grow_row_tile(tm, grid, target_rows, min_grid=2):
    """Grow a row tile by an integer factor of the grid (so the already-padded
    array still tiles evenly) while keeping >= min_grid steps."""
    best = 1
    for f in range(1, grid + 1):
        if grid % f == 0 and tm * f <= target_rows and grid // f >= min(min_grid, grid):
            best = f
    return tm * best, grid // best


def _compiler_params():
    return pltpu.CompilerParams(dimension_semantics=("parallel",),
                                vmem_limit_bytes=VMEM_LIMIT)


# ------------------------------ FBLOCK -------------------------------------

def fblock_forward(x_nchw, params, *, tm_target=512, tm_elem_target=2048):
    """Forward pass of FBLOCK. x_nchw: (B, Cin, H, W) f32 -> (B, Cout, H//2, W//2)."""
    w1, b1, gamma, beta, w2, b2 = (params[k] for k in
                                   ("w1", "b1", "gamma", "beta", "w2", "b2"))
    B, Cin, H, W = x_nchw.shape
    Cout = w1.shape[0]
    npad = _round_up(Cout, LANE)                          # lane-dense output width

    x_nhwc = jnp.transpose(x_nchw, (0, 2, 3, 1)).astype(jnp.bfloat16)

    # ---- stage 1: conv3x3 s1 + bias, with per-tile BN partial stats --------
    p1, H1, W1 = _im2col_3x3(x_nhwc, stride=1)            # (M1, 9*Cin) bf16
    m1 = p1.shape[0]
    k1 = _round_up(9 * Cin, 16)                           # full-dim K block, no 128 pad
    tm1, m1pad, g1 = _tile_m(m1, tm_target)
    p1 = _pad2d(p1, m1pad, k1)

    w1m = jnp.transpose(w1, (2, 3, 1, 0)).reshape(9 * Cin, Cout)
    w1m = _pad2d(w1m, k1, npad).astype(jnp.bfloat16)
    b1p = _pad2d(b1.reshape(1, Cout).astype(jnp.float32), 1, npad)

    y1_raw, stats = pl.pallas_call(
        functools.partial(conv_bias_stats_kernel, tm=tm1, m_total=m1),
        grid=(g1,),
        in_specs=[
            pl.BlockSpec((tm1, k1), lambda i: (i, 0)),
            pl.BlockSpec((k1, npad), lambda i: (0, 0)),     # resident weights
            pl.BlockSpec((1, npad), lambda i: (0, 0)),
        ],
        out_specs=(
            pl.BlockSpec((tm1, npad), lambda i: (i, 0)),
            pl.BlockSpec((1, SUBLANE, npad), lambda i: (i, 0, 0)),
        ),
        out_shape=(
            jax.ShapeDtypeStruct((m1pad, npad), jnp.bfloat16),
            jax.ShapeDtypeStruct((g1, SUBLANE, npad), jnp.float32),
        ),
        compiler_params=_compiler_params(),
        cost_estimate=pl.CostEstimate(
            flops=2 * m1pad * k1 * npad, transcendentals=0,
            bytes_accessed=p1.size * 2 + w1m.size * 2
                           + m1pad * npad * 2 + g1 * SUBLANE * npad * 4),
    )(p1, w1m, b1p)

    # ---- global BatchNorm stats (train mode: biased var over N*H*W) --------
    ssum = jnp.sum(stats[:, 0, :], axis=0)                # (npad,)
    ssq = jnp.sum(stats[:, 1, :], axis=0)
    mean = ssum / m1
    var = jnp.maximum(ssq / m1 - mean * mean, 0.0)
    gamma_p = jnp.pad(gamma, (0, npad - Cout))
    beta_p = jnp.pad(beta, (0, npad - Cout))
    scale = gamma_p * jax.lax.rsqrt(var + BN_EPS)         # padded chans -> 0
    shift = beta_p - mean * scale

    # ---- stage 2: apply BN + LeakyReLU (elementwise, larger tiles) ---------
    tm_e, g_e = _grow_row_tile(tm1, g1, tm_elem_target)
    y1_act = pl.pallas_call(
        bn_apply_lrelu_kernel,
        grid=(g_e,),
        in_specs=[
            pl.BlockSpec((tm_e, npad), lambda i: (i, 0)),
            pl.BlockSpec((1, npad), lambda i: (0, 0)),
            pl.BlockSpec((1, npad), lambda i: (0, 0)),
        ],
        out_specs=pl.BlockSpec((tm_e, npad), lambda i: (i, 0)),
        out_shape=jax.ShapeDtypeStruct((m1pad, npad), jnp.bfloat16),
        compiler_params=_compiler_params(),
        cost_estimate=pl.CostEstimate(
            flops=3 * m1pad * npad, transcendentals=0,
            bytes_accessed=m1pad * npad * 4),
    )(y1_raw, scale.reshape(1, npad), shift.reshape(1, npad))

    # drop the channel padding BEFORE the stage-3 im2col (9x smaller K2)
    y1_nhwc = y1_act[:m1, :Cout].reshape(B, H1, W1, Cout)

    # ---- stage 3: down_sample conv3x3 s2 + bias + LeakyReLU ----------------
    p2, H2, W2 = _im2col_3x3(y1_nhwc, stride=2)           # (M2, 9*Cout) bf16
    m2 = p2.shape[0]
    k2 = _round_up(9 * Cout, 16)                          # full-dim K block
    tm2, m2pad, g2 = _tile_m(m2, tm_target)
    p2 = _pad2d(p2, m2pad, k2)

    w2m = jnp.transpose(w2, (2, 3, 1, 0)).reshape(9 * Cout, Cout)
    w2m = _pad2d(w2m, k2, npad).astype(jnp.bfloat16)
    b2p = _pad2d(b2.reshape(1, Cout).astype(jnp.float32), 1, npad)

    y2 = pl.pallas_call(
        conv_bias_lrelu_kernel,
        grid=(g2,),
        in_specs=[
            pl.BlockSpec((tm2, k2), lambda i: (i, 0)),
            pl.BlockSpec((k2, npad), lambda i: (0, 0)),
            pl.BlockSpec((1, npad), lambda i: (0, 0)),
        ],
        out_specs=pl.BlockSpec((tm2, npad), lambda i: (i, 0)),
        out_shape=jax.ShapeDtypeStruct((m2pad, npad), jnp.float32),
        compiler_params=_compiler_params(),
        cost_estimate=pl.CostEstimate(
            flops=2 * m2pad * k2 * npad, transcendentals=0,
            bytes_accessed=p2.size * 2 + w2m.size * 2 + m2pad * npad * 4),
    )(p2, w2m, b2p)

    y2 = y2[:m2, :Cout].reshape(B, H2, W2, Cout)
    return jnp.transpose(y2, (0, 3, 1, 2))                # back to NCHW


# ------------------------- reference & params -------------------------------

def fblock_reference(x, params):
    """Pure-XLA f32 reference matching the PyTorch module forward."""
    w1, b1, gamma, beta, w2, b2 = (params[k] for k in
                                   ("w1", "b1", "gamma", "beta", "w2", "b2"))
    dn = ("NCHW", "OIHW", "NCHW")
    y = jax.lax.conv_general_dilated(x, w1, (1, 1), ((1, 1), (1, 1)),
                                     dimension_numbers=dn) + b1.reshape(1, -1, 1, 1)
    mean = jnp.mean(y, axis=(0, 2, 3), keepdims=True)
    var = jnp.mean((y - mean) ** 2, axis=(0, 2, 3), keepdims=True)
    y = (y - mean) * jax.lax.rsqrt(var + BN_EPS)
    y = y * gamma.reshape(1, -1, 1, 1) + beta.reshape(1, -1, 1, 1)
    y = jnp.where(y > 0, y, NEG_SLOPE * y)
    y = jax.lax.conv_general_dilated(y, w2, (2, 2), ((1, 1), (1, 1)),
                                     dimension_numbers=dn) + b2.reshape(1, -1, 1, 1)
    return jnp.where(y > 0, y, NEG_SLOPE * y)


def init_fblock_params(key, in_channels, out_channels):
    k1, k2, k3, k4 = jax.random.split(key, 4)
    oc = out_channels
    return {
        "w1": 0.1 * jax.random.normal(k1, (oc, in_channels, 3, 3), jnp.float32),
        "b1": 0.05 * jax.random.normal(k2, (oc,), jnp.float32),
        "gamma": jnp.ones((oc,), jnp.float32)
                 + 0.1 * jnp.arange(oc, dtype=jnp.float32) / oc,
        "beta": 0.02 * jnp.arange(oc, dtype=jnp.float32),
        "w2": 0.1 * jax.random.normal(k3, (oc, oc, 3, 3), jnp.float32),
        "b2": 0.05 * jax.random.normal(k4, (oc,), jnp.float32),
    }


if __name__ == "__main__":
    key = jax.random.PRNGKey(0)
    kx, kp = jax.random.split(key)

    B, Cin, Cout, H, W = 2, 4, 8, 16, 16
    x = jax.random.normal(kx, (B, Cin, H, W), jnp.float32)     # NCHW like PyTorch
    params = init_fblock_params(kp, Cin, Cout)

    out = jax.jit(fblock_forward)(x, params)
    out = jax.block_until_ready(out)
    assert out.shape == (B, Cout, H // 2, W // 2)

    ref = jax.block_until_ready(fblock_reference(x, params))
    max_err = float(jnp.max(jnp.abs(out - ref)))
    assert max_err < 0.1, f"max abs error vs reference too large: {max_err}"

    print("KERNEL_OK")
</pallas_src>

<mosaic_0001>
module attributes {stable_mosaic.version = 11 : i64} {
  func.func @conv_bias_stats_kernel(%arg0: i32, %arg1: memref<256x48xbf16, #tpu.memory_space<vmem>>, %arg2: memref<48x128xbf16, #tpu.memory_space<vmem>>, %arg3: memref<1x128xf32, #tpu.memory_space<vmem>>, %arg4: memref<256x128xbf16, #tpu.memory_space<vmem>>, %arg5: memref<1x8x128xf32, #tpu.memory_space<vmem>>) attributes {dimension_semantics = [#tpu.dimension_semantics<parallel>], iteration_bounds = array<i64: 2>, scalar_prefetch = 0 : i64, scratch_operands = 0 : i64, tpu.core_type = #tpu.core_type<tc>, window_params = [{transform_indices = @transform_0, window_bounds = array<i64: 256, 48>}, {pipeline_mode = #tpu.pipeline_mode<synchronous>, transform_indices = @transform_1, window_bounds = array<i64: 48, 128>}, {pipeline_mode = #tpu.pipeline_mode<synchronous>, transform_indices = @transform_2, window_bounds = array<i64: 1, 128>}, {transform_indices = @transform_3, window_bounds = array<i64: 256, 128>}, {transform_indices = @transform_4, window_bounds = array<i64: 1, 8, 128>}]} {
    %c0 = arith.constant 0 : index
    %c0_0 = arith.constant 0 : index
    %0 = vector.load %arg1[%c0, %c0_0] : memref<256x48xbf16, #tpu.memory_space<vmem>>, vector<256x48xbf16>
    %c0_1 = arith.constant 0 : index
    %c0_2 = arith.constant 0 : index
    %1 = vector.load %arg2[%c0_1, %c0_2] : memref<48x128xbf16, #tpu.memory_space<vmem>>, vector<48x128xbf16>
    %cst = arith.constant dense<0.000000e+00> : vector<256x128xf32>
    %2 = tpu.matmul %0, %1, %cst {dimension_numbers = #tpu.dot_dimension_numbers<[1], [0], [0], [1], [0, 0, 1, 1], [], []>} : vector<256x48xbf16>, vector<48x128xbf16>, vector<256x128xf32> -> vector<256x128xf32>
    %c0_3 = arith.constant 0 : index
    %c0_4 = arith.constant 0 : index
    %3 = vector.load %arg3[%c0_3, %c0_4] : memref<1x128xf32, #tpu.memory_space<vmem>>, vector<1x128xf32>
    %4 = vector.broadcast %3 : vector<1x128xf32> to vector<256x128xf32>
    %5 = arith.addf %2, %4 : vector<256x128xf32>
    %c256_i32 = arith.constant 256 : i32
    %6 = arith.muli %arg0, %c256_i32 : i32
    %7 = tpu.iota {dimensions = array<i32: 0>} : vector<256x128xi32>
    %8 = vector.broadcast %6 : i32 to vector<256x128xi32>
    %9 = arith.addi %8, %7 : vector<256x128xi32>
    %c512_i32 = arith.constant 512 : i32
    %10 = vector.broadcast %c512_i32 : i32 to vector<256x128xi32>
    %11 = arith.cmpi slt, %9, %10 : vector<256x128xi32>
    %cst_5 = arith.constant 0.000000e+00 : f32
    %12 = vector.broadcast %cst_5 : f32 to vector<256x128xf32>
    %13 = arith.select %11, %5, %12 : vector<256x128xi1>, vector<256x128xf32>
    %cst_6 = arith.constant dense<0.000000e+00> : vector<128xf32>
    %14 = vector.multi_reduction <add>, %13, %cst_6 [0] : vector<256x128xf32> to vector<128xf32>
    %15 = vector.shape_cast %14 : vector<128xf32> to vector<1x128xf32>
    %16 = arith.mulf %13, %13 : vector<256x128xf32>
    %cst_7 = arith.constant dense<0.000000e+00> : vector<128xf32>
    %17 = vector.multi_reduction <add>, %16, %cst_7 [0] : vector<256x128xf32> to vector<128xf32>
    %18 = vector.shape_cast %17 : vector<128xf32> to vector<1x128xf32>
    %19 = tpu.iota {dimensions = array<i32: 0>} : vector<8x128xi32>
    %c0_i32 = arith.constant 0 : i32
    %20 = vector.broadcast %c0_i32 : i32 to vector<8x128xi32>
    %21 = arith.cmpi eq, %19, %20 : vector<8x128xi32>
    %cst_8 = arith.constant 0.000000e+00 : f32
    %22 = vector.shape_cast %15 : vector<1x128xf32> to vector<1x128xf32>
    %23 = vector.broadcast %22 : vector<1x128xf32> to vector<8x128xf32>
    %24 = vector.broadcast %cst_8 : f32 to vector<8x128xf32>
    %25 = arith.select %21, %23, %24 : vector<8x128xi1>, vector<8x128xf32>
    %c1_i32 = arith.constant 1 : i32
    %26 = vector.broadcast %c1_i32 : i32 to vector<8x128xi32>
    %27 = arith.cmpi eq, %19, %26 : vector<8x128xi32>
    %cst_9 = arith.constant 0.000000e+00 : f32
    %28 = vector.shape_cast %18 : vector<1x128xf32> to vector<1x128xf32>
    %29 = vector.broadcast %28 : vector<1x128xf32> to vector<8x128xf32>
    %30 = vector.broadcast %cst_9 : f32 to vector<8x128xf32>
    %31 = arith.select %27, %29, %30 : vector<8x128xi1>, vector<8x128xf32>
    %32 = arith.addf %25, %31 : vector<8x128xf32>
    %c0_10 = arith.constant 0 : index
    %c0_11 = arith.constant 0 : index
    %c0_12 = arith.constant 0 : index
    %33 = vector.load %arg5[%c0_10, %c0_11, %c0_12] : memref<1x8x128xf32, #tpu.memory_space<vmem>>, vector<1x8x128xf32>
    %34 = vector.shape_cast %33 : vector<1x8x128xf32> to vector<8x128xf32>
    %35 = vector.shape_cast %32 : vector<8x128xf32> to vector<1x8x128xf32>
    tpu.vector_store %arg5[%c0_10, %c0_11, %c0_12], %35 {strides = array<i32>} : memref<1x8x128xf32, #tpu.memory_space<vmem>>, vector<1x8x128xf32>,
    %36 = arith.truncf %5 : vector<256x128xf32> to vector<256x128xbf16>
    %c0_13 = arith.constant 0 : index
    %c0_14 = arith.constant 0 : index
    %37 = vector.load %arg4[%c0_13, %c0_14] : memref<256x128xbf16, #tpu.memory_space<vmem>>, vector<256x128xbf16>
    tpu.vector_store %arg4[%c0_13, %c0_14], %36 {strides = array<i32>} : memref<256x128xbf16, #tpu.memory_space<vmem>>, vector<256x128xbf16>,
    return
  }
  func.func @transform_0(%arg0: i32) -> (i32, i32) {
    %c0_i32 = arith.constant 0 : i32
    %c0_i32_0 = arith.constant 0 : i32
    return %arg0, %c0_i32 : i32, i32
  }
  func.func @transform_1(%arg0: i32) -> (i32, i32) {
    %c0_i32 = arith.constant 0 : i32
    %c0_i32_0 = arith.constant 0 : i32
    %c0_i32_1 = arith.constant 0 : i32
    return %c0_i32, %c0_i32_0 : i32, i32
  }
  func.func @transform_2(%arg0: i32) -> (i32, i32) {
    %c0_i32 = arith.constant 0 : i32
    %c0_i32_0 = arith.constant 0 : i32
    %c0_i32_1 = arith.constant 0 : i32
    return %c0_i32, %c0_i32_0 : i32, i32
  }
  func.func @transform_3(%arg0: i32) -> (i32, i32) {
    %c0_i32 = arith.constant 0 : i32
    %c0_i32_0 = arith.constant 0 : i32
    return %arg0, %c0_i32 : i32, i32
  }
  func.func @transform_4(%arg0: i32) -> (i32, i32, i32) {
    %c0_i32 = arith.constant 0 : i32
    %c0_i32_0 = arith.constant 0 : i32
    %c0_i32_1 = arith.constant 0 : i32
    return %arg0, %c0_i32, %c0_i32_0 : i32, i32, i32
  }
}

module attributes {stable_mosaic.version = 11 : i64} {
  func.func @bn_apply_lrelu_kernel(%arg0: i32, %arg1: memref<256x128xbf16, #tpu.memory_space<vmem>>, %arg2: memref<1x128xf32, #tpu.memory_space<vmem>>, %arg3: memref<1x128xf32, #tpu.memory_space<vmem>>, %arg4: memref<256x128xbf16, #tpu.memory_space<vmem>>) attributes {dimension_semantics = [#tpu.dimension_semantics<parallel>], iteration_bounds = array<i64: 2>, scalar_prefetch = 0 : i64, scratch_operands = 0 : i64, tpu.core_type = #tpu.core_type<tc>, window_params = [{transform_indices = @transform_0, window_bounds = array<i64: 256, 128>}, {pipeline_mode = #tpu.pipeline_mode<synchronous>, transform_indices = @transform_1, window_bounds = array<i64: 1, 128>}, {pipeline_mode = #tpu.pipeline_mode<synchronous>, transform_indices = @transform_2, window_bounds = array<i64: 1, 128>}, {transform_indices = @transform_3, window_bounds = array<i64: 256, 128>}]} {
    %c0 = arith.constant 0 : index
    %c0_0 = arith.constant 0 : index
    %0 = vector.load %arg1[%c0, %c0_0] : memref<256x128xbf16, #tpu.memory_space<vmem>>, vector<256x128xbf16>
    %1 = arith.extf %0 : vector<256x128xbf16> to vector<256x128xf32>
    %c0_1 = arith.constant 0 : index
    %c0_2 = arith.constant 0 : index
    %2 = vector.load %arg2[%c0_1, %c0_2] : memref<1x128xf32, #tpu.memory_space<vmem>>, vector<1x128xf32>
    %3 = vector.broadcast %2 : vector<1x128xf32> to vector<256x128xf32>
    %4 = arith.mulf %1, %3 : vector<256x128xf32>
    %c0_3 = arith.constant 0 : index
    %c0_4 = arith.constant 0 : index
    %5 = vector.load %arg3[%c0_3, %c0_4] : memref<1x128xf32, #tpu.memory_space<vmem>>, vector<1x128xf32>
    %6 = vector.broadcast %5 : vector<1x128xf32> to vector<256x128xf32>
    %7 = arith.addf %4, %6 : vector<256x128xf32>
    %cst = arith.constant 0.00999999977 : f32
    %8 = vector.broadcast %cst : f32 to vector<256x128xf32>
    %9 = arith.mulf %8, %7 : vector<256x128xf32>
    %10 = arith.maximumf %7, %9 : vector<256x128xf32>
    %11 = arith.truncf %10 : vector<256x128xf32> to vector<256x128xbf16>
    %c0_5 = arith.constant 0 : index
    %c0_6 = arith.constant 0 : index
    %12 = vector.load %arg4[%c0_5, %c0_6] : memref<256x128xbf16, #tpu.memory_space<vmem>>, vector<256x128xbf16>
    tpu.vector_store %arg4[%c0_5, %c0_6], %11 {strides = array<i32>} : memref<256x128xbf16, #tpu.memory_space<vmem>>, vector<256x128xbf16>,
    return
  }
  func.func @transform_0(%arg0: i32) -> (i32, i32) {
    %c0_i32 = arith.constant 0 : i32
    %c0_i32_0 = arith.constant 0 : i32
    return %arg0, %c0_i32 : i32, i32
  }
  func.func @transform_1(%arg0: i32) -> (i32, i32) {
    %c0_i32 = arith.constant 0 : i32
    %c0_i32_0 = arith.constant 0 : i32
    %c0_i32_1 = arith.constant 0 : i32
    return %c0_i32, %c0_i32_0 : i32, i32
  }
  func.func @transform_2(%arg0: i32) -> (i32, i32) {
    %c0_i32 = arith.constant 0 : i32
    %c0_i32_0 = arith.constant 0 : i32
    %c0_i32_1 = arith.constant 0 : i32
    return %c0_i32, %c0_i32_0 : i32, i32
  }
  func.func @transform_3(%arg0: i32) -> (i32, i32) {
    %c0_i32 = arith.constant 0 : i32
    %c0_i32_0 = arith.constant 0 : i32
    return %arg0, %c0_i32 : i32, i32
  }
}

module attributes {stable_mosaic.version = 11 : i64} {
  func.func @conv_bias_lrelu_kernel(%arg0: i32, %arg1: memref<64x80xbf16, #tpu.memory_space<vmem>>, %arg2: memref<80x128xbf16, #tpu.memory_space<vmem>>, %arg3: memref<1x128xf32, #tpu.memory_space<vmem>>, %arg4: memref<64x128xf32, #tpu.memory_space<vmem>>) attributes {dimension_semantics = [#tpu.dimension_semantics<parallel>], iteration_bounds = array<i64: 2>, scalar_prefetch = 0 : i64, scratch_operands = 0 : i64, tpu.core_type = #tpu.core_type<tc>, window_params = [{transform_indices = @transform_0, window_bounds = array<i64: 64, 80>}, {pipeline_mode = #tpu.pipeline_mode<synchronous>, transform_indices = @transform_1, window_bounds = array<i64: 80, 128>}, {pipeline_mode = #tpu.pipeline_mode<synchronous>, transform_indices = @transform_2, window_bounds = array<i64: 1, 128>}, {transform_indices = @transform_3, window_bounds = array<i64: 64, 128>}]} {
    %c0 = arith.constant 0 : index
    %c0_0 = arith.constant 0 : index
    %0 = vector.load %arg1[%c0, %c0_0] : memref<64x80xbf16, #tpu.memory_space<vmem>>, vector<64x80xbf16>
    %c0_1 = arith.constant 0 : index
    %c0_2 = arith.constant 0 : index
    %1 = vector.load %arg2[%c0_1, %c0_2] : memref<80x128xbf16, #tpu.memory_space<vmem>>, vector<80x128xbf16>
    %cst = arith.constant dense<0.000000e+00> : vector<64x128xf32>
    %2 = tpu.matmul %0, %1, %cst {dimension_numbers = #tpu.dot_dimension_numbers<[1], [0], [0], [1], [0, 0, 1, 1], [], []>} : vector<64x80xbf16>, vector<80x128xbf16>, vector<64x128xf32> -> vector<64x128xf32>
    %c0_3 = arith.constant 0 : index
    %c0_4 = arith.constant 0 : index
    %3 = vector.load %arg3[%c0_3, %c0_4] : memref<1x128xf32, #tpu.memory_space<vmem>>, vector<1x128xf32>
    %4 = vector.broadcast %3 : vector<1x128xf32> to vector<64x128xf32>
    %5 = arith.addf %2, %4 : vector<64x128xf32>
    %cst_5 = arith.constant 0.00999999977 : f32
    %6 = vector.broadcast %cst_5 : f32 to vector<64x128xf32>
    %7 = arith.mulf %6, %5 : vector<64x128xf32>
    %8 = arith.maximumf %5, %7 : vector<64x128xf32>
    %c0_6 = arith.constant 0 : index
    %c0_7 = arith.constant 0 : index
    %9 = vector.load %arg4[%c0_6, %c0_7] : memref<64x128xf32, #tpu.memory_space<vmem>>, vector<64x128xf32>
    tpu.vector_store %arg4[%c0_6, %c0_7], %8 {strides = array<i32>} : memref<64x128xf32, #tpu.memory_space<vmem>>, vector<64x128xf32>,
    return
  }
  func.func @transform_0(%arg0: i32) -> (i32, i32) {
    %c0_i32 = arith.constant 0 : i32
    %c0_i32_0 = arith.constant 0 : i32
    return %arg0, %c0_i32 : i32, i32
  }
  func.func @transform_1(%arg0: i32) -> (i32, i32) {
    %c0_i32 = arith.constant 0 : i32
    %c0_i32_0 = arith.constant 0 : i32
    %c0_i32_1 = arith.constant 0 : i32
    return %c0_i32, %c0_i32_0 : i32, i32
  }
  func.func @transform_2(%arg0: i32) -> (i32, i32) {
    %c0_i32 = arith.constant 0 : i32
    %c0_i32_0 = arith.constant 0 : i32
    %c0_i32_1 = arith.constant 0 : i32
    return %c0_i32, %c0_i32_0 : i32, i32
  }
  func.func @transform_3(%arg0: i32) -> (i32, i32) {
    %c0_i32 = arith.constant 0 : i32
    %c0_i32_0 = arith.constant 0 : i32
    return %arg0, %c0_i32 : i32, i32
  }
}

</mosaic_0001>

<bundles_post_ra>
// kernel: fblock_forward.4
= control target key start
LH: loop header
LB: loop body
LE: loop exit
PB: predicated region body
PF: predicated region fallthrough
CT: control target
= control target key end

     0   :  { %s717_s12 = smov 0   ;;  %s851_s0 = inlined_call_operand.vmem [shape: bf16[512,128], index: 0, kind: input, shape index: {}]   ;;  %s852_s1 = inlined_call_operand.vmem [shape: f32[1,128], index: 1, kind: input, shape index: {}]   ;;  %s853_s2 = inlined_call_operand.vmem [shape: f32[1,128], index: 2, kind: input, shape index: {}]   ;;  %s854_s3 = inlined_call_operand.vmem [shape: bf16[512,128], index: 3, kind: output, shape index: {}]  }
   0x1 LB: > { %s494_s13 = sadd.s32 4294967295, %s695_s12   ;;  %p498_p0 = scmp.ge.s32.totalorder %s695_s12, 1  ;;  %s695_s12 = sphi %s717_s12, %s13_s12  }
   0x2   : > { %p138_p1 = scmp.lt.s32.totalorder %s695_s12, 3 }
   0x4   : > { %p139_p2 = pnand %p498_p0, %p138_p1 }
   0x5   : > { %s499_s14 = sshll.u32 (!%p139_p2), %s494_s13, 5 }
   0x6   : > { %142 = sbr.rel (%p139_p2) target bundleno = 66 (0x42), region = 32  ;;  %p163_p3 = scmp.lt.s32.totalorder (!%p139_p2), %s499_s14, 63 }
   0xb   : > { %s856_s14 = smov (!%p163_p3, %s499_s14), 63  ;;  %v738_v0 = vld [vmem:[%s852_s1] ss:$0 sm:$0xff] }
   0xc   : > { %s500_s15 = sshll.u32 %s856_s14, 2  ;;  %v746_v6 = vld [vmem:[%s853_s2] ss:$0 sm:$0xff] }
   0xd   : > { %s733_s18 = scalar_lea.vmem %s851_s0, %s500_s15  ;;  %s772_s25 = scalar_lea.vmem %s854_s3, %s500_s15 }
   0xe   : > { %v506_v1 = vld [vmem:[%s733_s18] sm:$0xff]   ;;  %v649_v2 = vld [vmem:[%s733_s18 + $0x8] sm:$0xff]   ;;  %v650_v3 = vld [vmem:[%s733_s18 + $0x10] sm:$0xff]  }
   0xf   : > { %v507_v4 = vunpack.c.l.bf16 %v506_v1  ;;  %v508_v5 = vunpack.c.h.bf16 %v506_v1  ;;  %v511_v7 = vunpack.c.l.bf16 %v649_v2  ;;  %v512_v8 = vunpack.c.h.bf16 %v649_v2  ;;  %v651_v9 = vld [vmem:[%s733_s18 + $0x18] sm:$0xff]   ;;  %v652_v22 = vld [vmem:[%s733_s18 + $0x20] sm:$0xff]   ;;  %v653_v43 = vld [vmem:[%s733_s18 + $0x28] sm:$0xff]  }
  0x10   : > { %v515_v10 = vunpack.c.l.bf16 %v650_v3  ;;  %v516_v11 = vunpack.c.h.bf16 %v650_v3  ;;  %v519_v12 = vunpack.c.l.bf16 %v651_v9  ;;  %v520_v13 = vunpack.c.h.bf16 %v651_v9  ;;  %v654_v48 = vld [vmem:[%s733_s18 + $0x30] sm:$0xff]   ;;  %v655_v53 = vld [vmem:[%s733_s18 + $0x38] sm:$0xff]  }
  0x11   : > { %v242_v14 = vmul.f32 %v738_v0, %v507_v4  ;;  %v243_v15 = vmul.f32 %v738_v0, %v508_v5  ;;  %v244_v16 = vmul.f32 %v738_v0, %v511_v7  ;;  %v245_v17 = vmul.f32 %v738_v0, %v512_v8 }
  0x12   : > { %v246_v18 = vmul.f32 %v738_v0, %v515_v10  ;;  %v247_v19 = vmul.f32 %v738_v0, %v516_v11  ;;  %v248_v20 = vmul.f32 %v738_v0, %v519_v12  ;;  %v249_v21 = vmul.f32 %v738_v0, %v520_v13  ;;  %v656_v12 = vld [vmem:[%s733_s18 + $0x40] sm:$0xff]  }
  0x13   : > { %v278_v23 = vadd.f32 %v746_v6, %v242_v14  ;;  %v279_v24 = vadd.f32 %v746_v6, %v243_v15  ;;  %v280_v25 = vadd.f32 %v746_v6, %v244_v16  ;;  %v281_v26 = vadd.f32 %v746_v6, %v245_v17 }
  0x14   : > { %v282_v27 = vadd.f32 %v746_v6, %v246_v18  ;;  %v283_v28 = vadd.f32 %v746_v6, %v247_v19  ;;  %v284_v29 = vadd.f32 %v746_v6, %v248_v20  ;;  %v285_v30 = vadd.f32 %v746_v6, %v249_v21 }
  0x15   : > { %v310_v31 = vmul.f32 0.01, %v278_v23  ;;  %v311_v32 = vmul.f32 0.01, %v279_v24  ;;  %v312_v33 = vmul.f32 0.01, %v280_v25  ;;  %v523_v34 = vunpack.c.l.bf16 %v652_v22 }
  0x16   : > { %v313_v35 = vmul.f32 0.01, %v281_v26  ;;  %v314_v36 = vmul.f32 0.01, %v282_v27  ;;  %v315_v37 = vmul.f32 0.01, %v283_v28  ;;  %v524_v38 = vunpack.c.h.bf16 %v652_v22 }
  0x17   : > { %v342_v39 = vmax.f32 %v278_v23, %v310_v31  ;;  %v343_v40 = vmax.f32 %v279_v24, %v311_v32  ;;  %v344_v41 = vmax.f32 %v280_v25, %v312_v33  ;;  %v316_v42 = vmul.f32 0.01, %v284_v29  ;;  %v657_v25 = vld [vmem:[%s733_s18 + $0x48] sm:$0xff]  }
  0x18   : > { %v345_v44 = vmax.f32 %v281_v26, %v313_v35  ;;  %v346_v45 = vmax.f32 %v282_v27, %v314_v36  ;;  %v347_v46 = vmax.f32 %v283_v28, %v315_v37  ;;  %v317_v47 = vmul.f32 0.01, %v285_v30 }
  0x19   : > { %v572_v49 = vpack.c.bf16 %v343_v40, %v342_v39  ;;  %v348_v50 = vmax.f32 %v284_v29, %v316_v42  ;;  %v250_v51 = vmul.f32 %v738_v0, %v523_v34  ;;  %v251_v52 = vmul.f32 %v738_v0, %v524_v38  ;;  %v658_v34 = vld [vmem:[%s733_s18 + $0x50] sm:$0xff]  }
  0x1a   : > { %v577_v54 = vpack.c.bf16 %v345_v44, %v344_v41  ;;  %v582_v55 = vpack.c.bf16 %v347_v46, %v346_v45  ;;  %v349_v56 = vmax.f32 %v285_v30, %v317_v47  ;;  %v527_v57 = vunpack.c.l.bf16 %v653_v43 }
  0x1b   : > { %573 = vst [vmem:[%s772_s25] sm:$0xff] %v572_v49   ;;  %v286_v58 = vadd.f32 %v746_v6, %v250_v51  ;;  %v287_v59 = vadd.f32 %v746_v6, %v251_v52  ;;  %v528_v60 = vunpack.c.h.bf16 %v653_v43  ;;  %v531_v61 = vunpack.c.l.bf16 %v654_v48  ;;  %v659_v43 = vld [vmem:[%s733_s18 + $0x58] sm:$0xff]  }
  0x1c   : > { %664 = vst [vmem:[%s772_s25 + $0x8] sm:$0xff] %v577_v54   ;;  %v587_v62 = vpack.c.bf16 %v349_v56, %v348_v50  ;;  %v252_v63 = vmul.f32 %v738_v0, %v527_v57  ;;  %v532_v1 = vunpack.c.h.bf16 %v654_v48  ;;  %v535_v2 = vunpack.c.l.bf16 %v655_v53  ;;  %v660_v56 = vld [vmem:[%s733_s18 + $0x60] sm:$0xff]  }
  0x1d   : > { %665 = vst [vmem:[%s772_s25 + $0x10] sm:$0xff] %v582_v55   ;;  %v318_v3 = vmul.f32 0.01, %v286_v58  ;;  %v319_v4 = vmul.f32 0.01, %v287_v59  ;;  %v253_v5 = vmul.f32 %v738_v0, %v528_v60  ;;  %v254_v7 = vmul.f32 %v738_v0, %v531_v61 }
  0x1e   : > { %666 = vst [vmem:[%s772_s25 + $0x18] sm:$0xff] %v587_v62   ;;  %v288_v8 = vadd.f32 %v746_v6, %v252_v63  ;;  %v255_v9 = vmul.f32 %v738_v0, %v532_v1  ;;  %v536_v10 = vunpack.c.h.bf16 %v655_v53  ;;  %v256_v11 = vmul.f32 %v738_v0, %v535_v2 }
  0x1f   : > { %v350_v13 = vmax.f32 %v286_v58, %v318_v3  ;;  %v351_v14 = vmax.f32 %v287_v59, %v319_v4  ;;  %v289_v15 = vadd.f32 %v746_v6, %v253_v5  ;;  %v290_v16 = vadd.f32 %v746_v6, %v254_v7 }
  0x20   : > { %v320_v17 = vmul.f32 0.01, %v288_v8  ;;  %v291_v18 = vadd.f32 %v746_v6, %v255_v9  ;;  %v257_v19 = vmul.f32 %v738_v0, %v536_v10  ;;  %v292_v20 = vadd.f32 %v746_v6, %v256_v11  ;;  %v661_v11 = vld [vmem:[%s733_s18 + $0x68] sm:$0xff]  }
  0x21   : > { %v592_v21 = vpack.c.bf16 %v351_v14, %v350_v13  ;;  %v321_v22 = vmul.f32 0.01, %v289_v15  ;;  %v322_v23 = vmul.f32 0.01, %v290_v16  ;;  %v539_v24 = vunpack.c.l.bf16 %v656_v12 }
  0x22   : > { %v352_v26 = vmax.f32 %v288_v8, %v320_v17  ;;  %v323_v27 = vmul.f32 0.01, %v291_v18  ;;  %v293_v28 = vadd.f32 %v746_v6, %v257_v19  ;;  %v324_v29 = vmul.f32 0.01, %v292_v20 }
  0x23   : > { %667 = vst [vmem:[%s772_s25 + $0x20] sm:$0xff] %v592_v21   ;;  %v353_v30 = vmax.f32 %v289_v15, %v321_v22  ;;  %v354_v31 = vmax.f32 %v290_v16, %v322_v23  ;;  %v540_v32 = vunpack.c.h.bf16 %v656_v12  ;;  %v258_v33 = vmul.f32 %v738_v0, %v539_v24 }
  0x24   : > { %v355_v35 = vmax.f32 %v291_v18, %v323_v27  ;;  %v325_v36 = vmul.f32 0.01, %v293_v28  ;;  %v356_v37 = vmax.f32 %v292_v20, %v324_v29  ;;  %v543_v38 = vunpack.c.l.bf16 %v657_v25  ;;  %v662_v20 = vld [vmem:[%s733_s18 + $0x70] sm:$0xff]   ;;  %v663_v29 = vld [vmem:[%s733_s18 + $0x78] sm:$0xff]  }
  0x25   : > { %v597_v39 = vpack.c.bf16 %v353_v30, %v352_v26  ;;  %v259_v40 = vmul.f32 %v738_v0, %v540_v32  ;;  %v294_v41 = vadd.f32 %v746_v6, %v258_v33  ;;  %v544_v42 = vunpack.c.h.bf16 %v657_v25 }
  0x26   : > { %v602_v44 = vpack.c.bf16 %v355_v35, %v354_v31  ;;  %v357_v45 = vmax.f32 %v293_v28, %v325_v36  ;;  %v260_v46 = vmul.f32 %v738_v0, %v543_v38  ;;  %v547_v47 = vunpack.c.l.bf16 %v658_v34 }
  0x27   : > { %668 = vst [vmem:[%s772_s25 + $0x28] sm:$0xff] %v597_v39   ;;  %v295_v48 = vadd.f32 %v746_v6, %v259_v40  ;;  %v326_v49 = vmul.f32 0.01, %v294_v41  ;;  %v261_v50 = vmul.f32 %v738_v0, %v544_v42  ;;  %v548_v51 = vunpack.c.h.bf16 %v658_v34 }
  0x28   : > { %669 = vst [vmem:[%s772_s25 + $0x30] sm:$0xff] %v602_v44   ;;  %v607_v52 = vpack.c.bf16 %v357_v45, %v356_v37  ;;  %v296_v53 = vadd.f32 %v746_v6, %v260_v46  ;;  %v262_v54 = vmul.f32 %v738_v0, %v547_v47  ;;  %v551_v55 = vunpack.c.l.bf16 %v659_v43 }
  0x29   : > { %v327_v57 = vmul.f32 0.01, %v295_v48  ;;  %v358_v58 = vmax.f32 %v294_v41, %v326_v49  ;;  %v297_v59 = vadd.f32 %v746_v6, %v261_v50  ;;  %v263_v60 = vmul.f32 %v738_v0, %v548_v51 }
  0x2a   : > { %670 = vst [vmem:[%s772_s25 + $0x38] sm:$0xff] %v607_v52   ;;  %v328_v61 = vmul.f32 0.01, %v296_v53  ;;  %v298_v62 = vadd.f32 %v746_v6, %v262_v54  ;;  %v552_v63 = vunpack.c.h.bf16 %v659_v43  ;;  %v264_v1 = vmul.f32 %v738_v0, %v551_v55 }
  0x2b   : > { %v359_v2 = vmax.f32 %v295_v48, %v327_v57  ;;  %v329_v3 = vmul.f32 0.01, %v297_v59  ;;  %v299_v4 = vadd.f32 %v746_v6, %v263_v60  ;;  %v555_v5 = vunpack.c.l.bf16 %v660_v56 }
  0x2c   : > { %v360_v7 = vmax.f32 %v296_v53, %v328_v61  ;;  %v330_v8 = vmul.f32 0.01, %v298_v62  ;;  %v265_v9 = vmul.f32 %v738_v0, %v552_v63  ;;  %v300_v10 = vadd.f32 %v746_v6, %v264_v1 }
  0x2d   : > { %v612_v12 = vpack.c.bf16 %v359_v2, %v358_v58  ;;  %v361_v13 = vmax.f32 %v297_v59, %v329_v3  ;;  %v331_v14 = vmul.f32 0.01, %v299_v4  ;;  %v556_v15 = vunpack.c.h.bf16 %v660_v56 }
  0x2e   : > { %v362_v16 = vmax.f32 %v298_v62, %v330_v8  ;;  %v301_v17 = vadd.f32 %v746_v6, %v265_v9  ;;  %v332_v18 = vmul.f32 0.01, %v300_v10  ;;  %v266_v19 = vmul.f32 %v738_v0, %v555_v5 }
  0x2f   : > { %671 = vst [vmem:[%s772_s25 + $0x40] sm:$0xff] %v612_v12   ;;  %v617_v21 = vpack.c.bf16 %v361_v13, %v360_v7  ;;  %v363_v22 = vmax.f32 %v299_v4, %v331_v14  ;;  %v267_v23 = vmul.f32 %v738_v0, %v556_v15  ;;  %v559_v24 = vunpack.c.l.bf16 %v661_v11 }
  0x30   : > { %v333_v25 = vmul.f32 0.01, %v301_v17  ;;  %v364_v26 = vmax.f32 %v300_v10, %v332_v18  ;;  %v302_v27 = vadd.f32 %v746_v6, %v266_v19  ;;  %v560_v28 = vunpack.c.h.bf16 %v661_v11 }
  0x31   : > { %672 = vst [vmem:[%s772_s25 + $0x48] sm:$0xff] %v617_v21   ;;  %v622_v30 = vpack.c.bf16 %v363_v22, %v362_v16  ;;  %v303_v31 = vadd.f32 %v746_v6, %v267_v23  ;;  %v268_v32 = vmul.f32 %v738_v0, %v559_v24  ;;  %v563_v33 = vunpack.c.l.bf16 %v662_v20 }
  0x32   : > { %v365_v34 = vmax.f32 %v301_v17, %v333_v25  ;;  %v334_v35 = vmul.f32 0.01, %v302_v27  ;;  %v269_v36 = vmul.f32 %v738_v0, %v560_v28  ;;  %v564_v37 = vunpack.c.h.bf16 %v662_v20 }
  0x33   : > { %673 = vst [vmem:[%s772_s25 + $0x50] sm:$0xff] %v622_v30   ;;  %v335_v38 = vmul.f32 0.01, %v303_v31  ;;  %v304_v39 = vadd.f32 %v746_v6, %v268_v32  ;;  %v270_v40 = vmul.f32 %v738_v0, %v563_v33  ;;  %v567_v41 = vunpack.c.l.bf16 %v663_v29 }
  0x34   : > { %v627_v42 = vpack.c.bf16 %v365_v34, %v364_v26  ;;  %v366_v43 = vmax.f32 %v302_v27, %v334_v35  ;;  %v305_v44 = vadd.f32 %v746_v6, %v269_v36  ;;  %v271_v45 = vmul.f32 %v738_v0, %v564_v37 }
  0x35   : > { %v367_v46 = vmax.f32 %v303_v31, %v335_v38  ;;  %v336_v47 = vmul.f32 0.01, %v304_v39  ;;  %v306_v48 = vadd.f32 %v746_v6, %v270_v40  ;;  %v568_v49 = vunpack.c.h.bf16 %v663_v29 }
  0x36   : > { %674 = vst [vmem:[%s772_s25 + $0x58] sm:$0xff] %v627_v42   ;;  %v337_v50 = vmul.f32 0.01, %v305_v44  ;;  %v307_v51 = vadd.f32 %v746_v6, %v271_v45  ;;  %v272_v52 = vmul.f32 %v738_v0, %v567_v41 }
  0x37   : > { %v632_v53 = vpack.c.bf16 %v367_v46, %v366_v43  ;;  %v368_v54 = vmax.f32 %v304_v39, %v336_v47  ;;  %v338_v55 = vmul.f32 0.01, %v306_v48  ;;  %v273_v56 = vmul.f32 %v738_v0, %v568_v49 }
  0x38   : > { %v369_v57 = vmax.f32 %v305_v44, %v337_v50  ;;  %v339_v58 = vmul.f32 0.01, %v307_v51  ;;  %v308_v59 = vadd.f32 %v746_v6, %v272_v52 }
  0x39   : > { %675 = vst [vmem:[%s772_s25 + $0x60] sm:$0xff] %v632_v53   ;;  %v370_v60 = vmax.f32 %v306_v48, %v338_v55  ;;  %v309_v61 = vadd.f32 %v746_v6, %v273_v56 }
  0x3a   : > { %v637_v62 = vpack.c.bf16 %v369_v57, %v368_v54  ;;  %v371_v63 = vmax.f32 %v307_v51, %v339_v58  ;;  %v340_v1 = vmul.f32 0.01, %v308_v59 }
  0x3b   : > { %v341_v2 = vmul.f32 0.01, %v309_v61 }
  0x3c   : > { %676 = vst [vmem:[%s772_s25 + $0x68] sm:$0xff] %v637_v62   ;;  %v642_v3 = vpack.c.bf16 %v371_v63, %v370_v60  ;;  %v372_v4 = vmax.f32 %v308_v59, %v340_v1 }
  0x3d   : > { %v373_v5 = vmax.f32 %v309_v61, %v341_v2 }
  0x3e   : > { %677 = vst [vmem:[%s772_s25 + $0x70] sm:$0xff] %v642_v3  }
  0x3f   : > { %v647_v7 = vpack.c.bf16 %v373_v5, %v372_v4 }
  0x41   : > { %678 = vst [vmem:[%s772_s25 + $0x78] sm:$0xff] %v647_v7  }
  0x42 PF: > { %s13_s12 = sadd.s32 1, %s695_s12  }
  0x43   : > { %p10_p4 = scmp.ge.s32.totalorder %s13_s12, 4  }
  0x45   :  { %12 = sbr.rel (!%p10_p4) target bundleno = 1 (0x1), region = 62 }

// kernel: fblock_forward.3
= control target key start
LH: loop header
LB: loop body
LE: loop exit
PB: predicated region body
PF: predicated region fallthrough
CT: control target
= control target key end

     0   :  { %s1155_s15 = smov 0   ;;  %s1479_s0 = inlined_call_operand.vmem [shape: bf16[512,48], index: 0, kind: input, shape index: {}]   ;;  %s1480_s1 = inlined_call_operand.vmem [shape: bf16[48,128], index: 1, kind: input, shape index: {}]   ;;  %s1481_s2 = inlined_call_operand.vmem [shape: f32[1,128], index: 2, kind: input, shape index: {}]   ;;  %s1482_s3 = inlined_call_operand.vmem [shape: bf16[512,128], index: 3, kind: output, shape index: {0}]   ;;  %s1483_s4 = inlined_call_operand.vmem [shape: f32[2,8,128], index: 4, kind: output, shape index: {1}]  }
   0x1 LB: > { %s1161_s16 = sadd.s32 4294967295, %s1128_s15   ;;  %p889_p0 = scmp.ge.s32.totalorder %s1128_s15, 1  ;;  %s1128_s15 = sphi %s1155_s15, %s15_s15  }
   0x2   : > { %p166_p1 = scmp.lt.s32.totalorder %s1128_s15, 3 }
   0x4   : > { %p167_p2 = pnand %p889_p0, %p166_p1 }
   0x5   : > { %s890_s19 = sshll.u32 (!%p167_p2), %s1161_s16, 5  ;;  %s987_s7 = sshll.u32 (!%p167_p2), %s1161_s16, 8 }
   0x6   : > { %170 = sbr.rel (%p167_p2) target bundleno = 276 (0x114), region = 32  ;;  %p197_p3 = scmp.lt.s32.totalorder (!%p167_p2), %s890_s19, 63 }
   0x7   : > { %p208_p4 = scmp.lt.s32.totalorder (!%p167_p2), %s1161_s16, 1 }
   0xb   : > { %v1008_v0 = vld [vmem:[%s1480_s1 + $0x10] sm:$0xff]  ;;  %v1007_v1 = vld [vmem:[%s1480_s1 + $0x8] sm:$0xff]  ;;  %s1485_s19 = smov (!%p197_p3, %s890_s19), 63  ;;  %v1006_v2 = vld [vmem:[%s1480_s1] sm:$0xff]  ;;  %vm353_vm0 = vcmask 392192   ;;  %v492_v43 = vlaneseq  ;;  %v1290_v60 = vstv %s987_s7  ;;  %s1487_s16 = smov (!%p208_p4, %s1161_s16), 1 }
   0xc   : > { %407 = vmatpush.bf16.msra.mxu0 %v1008_v0  ;;  %1104 = vmatpush.bf16.msra.mxu1 %v1008_v0  ;;  %s891_s22 = sshll.u32 %s1485_s19, 2  ;;  %v1220_v21 = vld [vmem:[%s1481_s2] ss:$0 sm:$0xff]  ;;  %s894_s8 = sshll.u32 %s1487_s16, 3 }
   0xd   : > { %1105 = vmatpush.bf16.msra.mxu2 %v1008_v0  ;;  %1106 = vmatpush.bf16.msra.mxu3 %v1008_v0  ;;  %s1183_s27 = scalar_lea.vmem %s1479_s0, %s891_s22  ;;  %s1239_s6 = scalar_lea.vmem %s1482_s3, %s891_s22  ;;  %v1278_v53 = vshrl.u32 %v492_v43, 7 }
   0xe   : > { %v990_v3 = vld [vmem:[%s1183_s27] sm:$0xff]  ;;  %v991_v7 = vld [vmem:[%s1183_s27 + $0x8] sm:$0xff]  ;;  %v992_v11 = vld [vmem:[%s1183_s27 + $0x10] sm:$0xff]  ;;  %s211_s11 = scalar_lea.vmem %s1483_s4, %s894_s8 }
   0xf   : > { %v994_v4 = vld [vmem:[%s1183_s27 + $0x20] sm:$0xff]  ;;  %v995_v8 = vld [vmem:[%s1183_s27 + $0x28] sm:$0xff]  ;;  %v996_v12 = vld [vmem:[%s1183_s27 + $0x30] sm:$0xff]  ;;  %v494_v54 = vadd.s32 8, %v1278_v53  ;;  %v495_v63 = vadd.s32 16, %v1278_v53 }
  0x10   : > { %408 = vmatpush.bf16.msra.mxu0 %v1007_v1  ;;  %1107 = vmatpush.bf16.msra.mxu1 %v1007_v1  ;;  %v998_v5 = vld [vmem:[%s1183_s27 + $0x40] sm:$0xff]  ;;  %v999_v9 = vld [vmem:[%s1183_s27 + $0x48] sm:$0xff]  ;;  %v1000_v13 = vld [vmem:[%s1183_s27 + $0x50] sm:$0xff] }
  0x11   : > { %1108 = vmatpush.bf16.msra.mxu2 %v1007_v1  ;;  %1109 = vmatpush.bf16.msra.mxu3 %v1007_v1  ;;  %v1002_v6 = vld [vmem:[%s1183_s27 + $0x60] sm:$0xff]  ;;  %v1003_v10 = vld [vmem:[%s1183_s27 + $0x68] sm:$0xff]  ;;  %v1004_v14 = vld [vmem:[%s1183_s27 + $0x70] sm:$0xff]  ;;  %v527_v62 = vadd.s32 %v1290_v60, %v494_v54  ;;  %v503_v54 = vadd.s32 80, %v1278_v53 }
  0x12   : > { %v993_v15 = vld [vmem:[%s1183_s27 + $0x18] sm:$0xff] }
  0x13   : > { %v997_v16 = vld [vmem:[%s1183_s27 + $0x38] sm:$0xff]  ;;  %vm559_vm1 = vcmp.lt.s32.totalorder %v527_v62, 512 }
  0x14   : > { %409 = vmatpush.bf16.msra.mxu0 %v1006_v2  ;;  %1110 = vmatpush.bf16.msra.mxu1 %v1006_v2  ;;  %v1001_v17 = vld [vmem:[%s1183_s27 + $0x58] sm:$0xff] }
  0x15   : > { %1111 = vmatpush.bf16.msra.mxu2 %v1006_v2  ;;  %1112 = vmatpush.bf16.msra.mxu3 %v1006_v2  ;;  %v1005_v18 = vld [vmem:[%s1183_s27 + $0x78] sm:$0xff]  ;;  %v526_v2 = vadd.s32 %v1290_v60, %v1278_v53 }
  0x17   : > { %971 = vmatmul.msk.bf16.vlgmr.msra.gmra.mxu0 %vm353_vm0, %v990_v3  ;;  %975 = vmatmul.msk.bf16.vlgmr.msra.gmra.mxu1 %vm353_vm0, %v994_v4  ;;  %v496_v3 = vadd.s32 24, %v1278_v53  ;;  %vm558_vm2 = vcmp.lt.s32.totalorder %v526_v2, 512 }
  0x18   : > { %979 = vmatmul.msk.bf16.vlgmr.msra.gmra.mxu2 %vm353_vm0, %v998_v5  ;;  %983 = vmatmul.msk.bf16.vlgmr.msra.gmra.mxu3 %vm353_vm0, %v1002_v6  ;;  %v528_v5 = vadd.s32 %v1290_v60, %v495_v63  ;;  %v497_v6 = vadd.s32 32, %v1278_v53  ;;  %v504_v63 = vadd.s32 88, %v1278_v53 }
  0x1a   : > { %vm560_vm3 = vcmp.lt.s32.totalorder %v528_v5, 512 }
  0x27   : > { %972 = vmatmul.msk.bf16.gmra.mxu0 %vm353_vm0, %v991_v7  ;;  %976 = vmatmul.msk.bf16.gmra.mxu1 %vm353_vm0, %v995_v8  ;;  %v501_v7 = vadd.s32 64, %v1278_v53  ;;  %v498_v8 = vadd.s32 40, %v1278_v53 }
  0x28   : > { %980 = vmatmul.msk.bf16.gmra.mxu2 %vm353_vm0, %v999_v9  ;;  %984 = vmatmul.msk.bf16.gmra.mxu3 %vm353_vm0, %v1003_v10 }
  0x37   : > { %973 = vmatmul.msk.bf16.gmra.mxu0 %vm353_vm0, %v992_v11  ;;  %977 = vmatmul.msk.bf16.gmra.mxu1 %vm353_vm0, %v996_v12  ;;  %v529_v12 = vadd.s32 %v1290_v60, %v496_v3 }
  0x38   : > { %981 = vmatmul.msk.bf16.gmra.mxu2 %vm353_vm0, %v1000_v13  ;;  %985 = vmatmul.msk.bf16.gmra.mxu3 %vm353_vm0, %v1004_v14 }
  0x39   : > { %vm561_vm4 = vcmp.lt.s32.totalorder %v529_v12, 512 }
  0x47   : > { %974 = vmatmul.msk.bf16.gmra.mxu0 %vm353_vm0, %v993_v15  ;;  %978 = vmatmul.msk.bf16.gmra.mxu1 %vm353_vm0, %v997_v16  ;;  %v502_v15 = vadd.s32 72, %v1278_v53 }
  0x48   : > { %982 = vmatmul.msk.bf16.gmra.mxu2 %vm353_vm0, %v1001_v17  ;;  %986 = vmatmul.msk.bf16.gmra.mxu3 %vm353_vm0, %v1005_v18 }
  0x94   : > { %v411_v19 = vpop.f32.mrf.mxu0  ;;  %v431_v20 = vpop.f32.mrf.mxu1 }
  0x95   : > { %v1223_v22 = vadd.f32 %v1220_v21, %v431_v20  ;;  %v1226_v26 = vadd.f32 %v1220_v21, %v411_v19 }
  0x9b   : > { %v451_v23 = vpop.f32.mrf.mxu2  ;;  %v471_v29 = vpop.f32.mrf.mxu3 }
  0x9c   : > { %v413_v24 = vpop.f32.mrf.mxu0  ;;  %v433_v25 = vpop.f32.mrf.mxu1  ;;  %v1248_v32 = vadd.f32 %v1220_v21, %v451_v23  ;;  %v1257_v39 = vadd.f32 %v1220_v21, %v471_v29  ;;  %v530_v23 = vadd.s32 %v1290_v60, %v497_v6  ;;  %v531_v29 = vadd.s32 %v1290_v60, %v498_v8 }
  0x9d   : > { %v1229_v27 = vadd.f32 %v1220_v21, %v413_v24  ;;  %v1232_v28 = vadd.f32 %v1220_v21, %v433_v25  ;;  %v499_v24 = vadd.s32 48, %v1278_v53  ;;  %v1328_v25 = vadd.s32 %v1290_v60, %v501_v7 }
  0x9e   : > { %vm562_vm5 = vcmp.lt.s32.totalorder %v530_v23, 512  ;;  %vm563_vm7 = vcmp.lt.s32.totalorder %v531_v29, 512  ;;  %v536_v8 = vadd.s32 %v1290_v60, %v503_v54 }
  0x9f   : > { %v1012_v30 = vpack.c.bf16 %v1229_v27, %v1226_v26  ;;  %v1032_v31 = vpack.c.bf16 %v1232_v28, %v1223_v22  ;;  %v591_v20 = vsel %vm559_vm1, %v1229_v27, 0.0  ;;  %vm566_vm6 = vcmp.lt.s32.totalorder %v1328_v25, 512 }
  0xa0   : > { %v660_v27 = vmul.f32 %v591_v20, %v591_v20  ;;  %vm568_vm11 = vcmp.lt.s32.totalorder %v536_v8, 512  ;;  %v507_v25 = vadd.s32 112, %v1278_v53 }
  0xa1   : > { %1013 = vst [vmem:[%s1239_s6] sm:$0xff] %v1012_v30  }
  0xa2   : > { %1092 = vst [vmem:[%s1239_s6 + $0x20] sm:$0xff] %v1032_v31   ;;  %v540_v8 = vadd.s32 %v1290_v60, %v507_v25 }
  0xa3   : > { %v453_v33 = vpop.f32.mrf.mxu2  ;;  %v473_v37 = vpop.f32.mrf.mxu3 }
  0xa4   : > { %v416_v34 = vpop.f32.mrf.mxu0  ;;  %v436_v35 = vpop.f32.mrf.mxu1  ;;  %v1251_v36 = vadd.f32 %v1220_v21, %v453_v33  ;;  %v1260_v40 = vadd.f32 %v1220_v21, %v473_v37  ;;  %v590_v33 = vsel %vm558_vm2, %v1226_v26, 0.0  ;;  %v532_v37 = vadd.s32 %v1290_v60, %v499_v24 }
  0xa5   : > { %v1263_v41 = vadd.f32 %v1220_v21, %v436_v35  ;;  %v417_v47 = vadd.f32 %v1220_v21, %v416_v34  ;;  %v535_v35 = vadd.s32 %v1290_v60, %v502_v15  ;;  %v510_v15 = vadd.s32 136, %v1278_v53 }
  0xa6   : > { %v1052_v38 = vpack.c.bf16 %v1251_v36, %v1248_v32  ;;  %v1072_v46 = vpack.c.bf16 %v1260_v40, %v1257_v39  ;;  %vm564_vm8 = vcmp.lt.s32.totalorder %v532_v37, 512  ;;  %vm572_vm0 = vcmp.lt.s32.totalorder %v540_v8, 512 }
  0xa7   : > { %v592_v34 = vsel %vm560_vm3, %v417_v47, 0.0  ;;  %vm567_vm9 = vcmp.lt.s32.totalorder %v535_v35, 512  ;;  %v600_v35 = vsel %vm568_vm11, %v1263_v41, 0.0 }
  0xa8   : > { %1096 = vst [vmem:[%s1239_s6 + $0x40] sm:$0xff] %v1052_v38  }
  0xa9   : > { %1100 = vst [vmem:[%s1239_s6 + $0x60] sm:$0xff] %v1072_v46  }
  0xab   : > { %v456_v42 = vpop.f32.mrf.mxu2  ;;  %v476_v50 = vpop.f32.mrf.mxu3 }
  0xac   : > { %v418_v44 = vpop.f32.mrf.mxu0  ;;  %v438_v45 = vpop.f32.mrf.mxu1  ;;  %v1285_v55 = vadd.f32 %v1220_v21, %v456_v42  ;;  %v1297_v1 = vadd.f32 %v1220_v21, %v476_v50  ;;  %v659_v42 = vmul.f32 %v590_v33, %v590_v33 }
  0xad   : > { %v1269_v48 = vadd.f32 %v1220_v21, %v418_v44  ;;  %v1272_v49 = vadd.f32 %v1220_v21, %v438_v45  ;;  %v622_v44 = vadd.f32 %v591_v20, %v590_v33  ;;  %v661_v45 = vmul.f32 %v592_v34, %v592_v34 }
  0xaf   : > { %v1017_v51 = vpack.c.bf16 %v1269_v48, %v417_v47  ;;  %v1037_v52 = vpack.c.bf16 %v1272_v49, %v1263_v41  ;;  %v593_v43 = vsel %vm561_vm4, %v1269_v48, 0.0  ;;  %v500_v47 = vadd.s32 56, %v1278_v53 }
  0xb1   : > { %1089 = vst [vmem:[%s1239_s6 + $0x8] sm:$0xff] %v1017_v51   ;;  %v533_v7 = vadd.s32 %v1290_v60, %v500_v47 }
  0xb2   : > { %1093 = vst [vmem:[%s1239_s6 + $0x28] sm:$0xff] %v1037_v52   ;;  %v691_v52 = vadd.f32 %v660_v27, %v659_v42 }
  0xb3   : > { %v458_v56 = vpop.f32.mrf.mxu2  ;;  %v478_v61 = vpop.f32.mrf.mxu3  ;;  %vm565_vm10 = vcmp.lt.s32.totalorder %v533_v7, 512 }
  0xb4   : > { %v421_v57 = vpop.f32.mrf.mxu0  ;;  %v441_v58 = vpop.f32.mrf.mxu1  ;;  %v1288_v59 = vadd.f32 %v1220_v21, %v458_v56  ;;  %v1304_v4 = vadd.f32 %v1220_v21, %v478_v61  ;;  %v662_v61 = vmul.f32 %v593_v43, %v593_v43  ;;  %v692_v3 = vadd.f32 %v691_v52, %v661_v45 }
  0xb5   : > { %v1311_v9 = vadd.f32 %v1220_v21, %v441_v58  ;;  %v422_v16 = vadd.f32 %v1220_v21, %v421_v57  ;;  %v623_v58 = vadd.f32 %v622_v44, %v592_v34  ;;  %v506_v34 = vadd.s32 104, %v1278_v53 }
  0xb6   : > { %v1057_v0 = vpack.c.bf16 %v1288_v59, %v1285_v55  ;;  %v1077_v11 = vpack.c.bf16 %v1304_v4, %v1297_v1  ;;  %v599_v44 = vsel %vm567_vm9, %v1232_v28, 0.0 }
  0xb7   : > { %v594_v56 = vsel %vm562_vm5, %v422_v16, 0.0  ;;  %v624_v5 = vadd.f32 %v623_v58, %v593_v43  ;;  %v539_v28 = vadd.s32 %v1290_v60, %v506_v34 }
  0xb8   : > { %1097 = vst [vmem:[%s1239_s6 + $0x48] sm:$0xff] %v1057_v0   ;;  %v663_v6 = vmul.f32 %v594_v56, %v594_v56 }
  0xb9   : > { %1101 = vst [vmem:[%s1239_s6 + $0x68] sm:$0xff] %v1077_v11   ;;  %vm571_vm14 = vcmp.lt.s32.totalorder %v539_v28, 512 }
  0xbb   : > { %v461_v10 = vpop.f32.mrf.mxu2  ;;  %v481_v19 = vpop.f32.mrf.mxu3 }
  0xbc   : > { %v423_v13 = vpop.f32.mrf.mxu0  ;;  %v443_v14 = vpop.f32.mrf.mxu1  ;;  %v1340_v38 = vadd.f32 %v1220_v21, %v461_v10  ;;  %v1356_v2 = vadd.f32 %v1220_v21, %v481_v19  ;;  %v509_v10 = vadd.s32 128, %v1278_v53  ;;  %v505_v19 = vadd.s32 96, %v1278_v53 }
  0xbd   : > { %v424_v17 = vadd.f32 %v1220_v21, %v423_v13  ;;  %v1320_v18 = vadd.f32 %v1220_v21, %v443_v14  ;;  %v693_v13 = vadd.f32 %v692_v3, %v662_v61  ;;  %v625_v14 = vadd.f32 %v624_v5, %v594_v56 }
  0xbe   : > { %v538_v47 = vadd.s32 %v1290_v60, %v505_v19  ;;  %v542_v3 = vadd.s32 %v1290_v60, %v509_v10  ;;  %v511_v5 = vadd.s32 144, %v1278_v53 }
  0xbf   : > { %v1022_v30 = vpack.c.bf16 %v424_v17, %v422_v16  ;;  %v1042_v31 = vpack.c.bf16 %v1320_v18, %v1311_v9  ;;  %v595_v0 = vsel %vm563_vm7, %v424_v17, 0.0  ;;  %v537_v17 = vadd.s32 %v1290_v60, %v504_v63 }
  0xc0   : > { %v664_v16 = vmul.f32 %v595_v0, %v595_v0  ;;  %v694_v29 = vadd.f32 %v693_v13, %v663_v6  ;;  %vm570_vm13 = vcmp.lt.s32.totalorder %v538_v47, 512  ;;  %v669_v13 = vmul.f32 %v600_v35, %v600_v35 }
  0xc1   : > { %1090 = vst [vmem:[%s1239_s6 + $0x10] sm:$0xff] %v1022_v30   ;;  %v626_v30 = vadd.f32 %v625_v14, %v595_v0  ;;  %vm569_vm12 = vcmp.lt.s32.totalorder %v537_v17, 512  ;;  %v668_v0 = vmul.f32 %v599_v44, %v599_v44  ;;  %vm574_vm15 = vcmp.lt.s32.totalorder %v542_v3, 512 }
  0xc2   : > { %1094 = vst [vmem:[%s1239_s6 + $0x30] sm:$0xff] %v1042_v31   ;;  %v695_v45 = vadd.f32 %v694_v29, %v664_v16  ;;  %v601_v14 = vsel %vm569_vm12, %v1272_v49, 0.0  ;;  %v602_v17 = vsel %vm570_vm13, %v1311_v9, 0.0  ;;  %v544_v34 = vadd.s32 %v1290_v60, %v511_v5 }
  0xc3   : > { %v463_v26 = vpop.f32.mrf.mxu2  ;;  %v483_v48 = vpop.f32.mrf.mxu3  ;;  %v671_v9 = vmul.f32 %v602_v17, %v602_v17 }
  0xc4   : > { %v426_v46 = vpop.f32.mrf.mxu0  ;;  %v446_v50 = vpop.f32.mrf.mxu1  ;;  %v1346_v51 = vadd.f32 %v1220_v21, %v463_v26  ;;  %v1363_v12 = vadd.f32 %v1220_v21, %v483_v48  ;;  %v598_v26 = vsel %vm566_vm6, %v1223_v22, 0.0  ;;  %vm576_vm3 = vcmp.lt.s32.totalorder %v544_v34, 512 }
  0xc5   : > { %v427_v57 = vadd.f32 %v1220_v21, %v426_v46  ;;  %v1369_v20 = vadd.f32 %v1220_v21, %v446_v50  ;;  %v667_v22 = vmul.f32 %v598_v26, %v598_v26 }
  0xc6   : > { %v1062_v62 = vpack.c.bf16 %v1346_v51, %v1340_v38  ;;  %v1082_v24 = vpack.c.bf16 %v1363_v12, %v1356_v2 }
  0xc7   : > { %v596_v11 = vsel %vm564_vm8, %v427_v57, 0.0 }
  0xc8   : > { %1098 = vst [vmem:[%s1239_s6 + $0x50] sm:$0xff] %v1062_v62   ;;  %v665_v31 = vmul.f32 %v596_v11, %v596_v11  ;;  %v627_v46 = vadd.f32 %v626_v30, %v596_v11  ;;  %v543_v30 = vadd.s32 %v1290_v60, %v510_v15 }
  0xc9   : > { %1102 = vst [vmem:[%s1239_s6 + $0x70] sm:$0xff] %v1082_v24  }
  0xca   : > { %v696_v56 = vadd.f32 %v695_v45, %v665_v31  ;;  %v670_v31 = vmul.f32 %v601_v14, %v601_v14  ;;  %v513_v45 = vadd.s32 160, %v1278_v53  ;;  %vm575_vm2 = vcmp.lt.s32.totalorder %v543_v30, 512 }
  0xcb   : > { %v466_v23 = vpop.f32.mrf.mxu2  ;;  %v486_v43 = vpop.f32.mrf.mxu3  ;;  %v607_v25 = vsel %vm575_vm2, %v1251_v36, 0.0  ;;  %vm730_vm2 = vcmp.eq.s32.totalorder %v1278_v53, 1 }
  0xcc   : > { %v428_v33 = vpop.f32.mrf.mxu0  ;;  %v448_v27 = vpop.f32.mrf.mxu1  ;;  %v1395_v63 = vadd.f32 %v1220_v21, %v466_v23  ;;  %v1406_v16 = vadd.f32 %v1220_v21, %v486_v43  ;;  %v512_v43 = vadd.s32 152, %v1278_v53  ;;  %v676_v36 = vmul.f32 %v607_v25, %v607_v25 }
  0xcd   : > { %v429_v37 = vadd.f32 %v1220_v21, %v428_v33  ;;  %v1376_v42 = vadd.f32 %v1220_v21, %v448_v27 }
  0xcf   : > { %v597_v50 = vsel %vm565_vm10, %v429_v37, 0.0  ;;  %v1027_v52 = vpack.c.bf16 %v429_v37, %v427_v57  ;;  %v1047_v54 = vpack.c.bf16 %v1376_v42, %v1369_v20  ;;  %v508_v57 = vadd.s32 120, %v1278_v53 }
  0xd0   : > { %v628_v48 = vadd.f32 %v627_v46, %v597_v50  ;;  %v666_v58 = vmul.f32 %v597_v50, %v597_v50  ;;  %v603_v37 = vsel %vm571_vm14, %v1320_v18, 0.0  ;;  %v606_v18 = vsel %vm574_vm15, %v1248_v32, 0.0 }
  0xd1   : > { %1091 = vst [vmem:[%s1239_s6 + $0x18] sm:$0xff] %v1027_v52   ;;  %v541_v24 = vadd.s32 %v1290_v60, %v508_v57  ;;  %v672_v46 = vmul.f32 %v603_v37, %v603_v37  ;;  %v545_v52 = vadd.s32 %v1290_v60, %v512_v43  ;;  %v675_v32 = vmul.f32 %v606_v18, %v606_v18 }
  0xd2   : > { %v629_v61 = vadd.f32 %v628_v48, %v598_v26  ;;  %v697_v62 = vadd.f32 %v696_v56, %v666_v58  ;;  %1095 = vst [vmem:[%s1239_s6 + $0x38] sm:$0xff] %v1047_v54   ;;  %v608_v57 = vsel %vm576_vm3, %v1285_v55, 0.0 }
  0xd3   : > { %v468_v6 = vpop.f32.mrf.mxu2  ;;  %v488_v10 = vpop.f32.mrf.mxu3  ;;  %vm573_vm1 = vcmp.lt.s32.totalorder %v541_v24, 512  ;;  %vm577_vm4 = vcmp.lt.s32.totalorder %v545_v52, 512 }
  0xd4   : > { %v630_v41 = vadd.f32 %v629_v61, %v599_v44  ;;  %v698_v7 = vadd.f32 %v697_v62, %v667_v22  ;;  %v1401_v11 = vadd.f32 %v1220_v21, %v468_v6  ;;  %v1415_v49 = vadd.f32 %v1220_v21, %v488_v10 }
  0xd5   : > { %v604_v44 = vsel %vm572_vm0, %v1369_v20, 0.0  ;;  %v605_v54 = vsel %vm573_vm1, %v1376_v42, 0.0  ;;  %v514_v20 = vadd.s32 168, %v1278_v53  ;;  %v546_v22 = vadd.s32 %v1290_v60, %v513_v45 }
  0xd6   : > { %v631_v19 = vadd.f32 %v630_v41, %v600_v35  ;;  %v699_v23 = vadd.f32 %v698_v7, %v668_v0  ;;  %v1067_v29 = vpack.c.bf16 %v1401_v11, %v1395_v63  ;;  %v1087_v15 = vpack.c.bf16 %v1415_v49, %v1406_v16 }
  0xd7   : > { %v673_v48 = vmul.f32 %v604_v44, %v604_v44  ;;  %v674_v61 = vmul.f32 %v605_v54, %v605_v54  ;;  %v515_v62 = vadd.s32 176, %v1278_v53  ;;  %v517_v0 = vadd.s32 192, %v1278_v53 }
  0xd8   : > { %v700_v33 = vadd.f32 %v699_v23, %v669_v13  ;;  %v632_v27 = vadd.f32 %v631_v19, %v601_v14  ;;  %1099 = vst [vmem:[%s1239_s6 + $0x58] sm:$0xff] %v1067_v29   ;;  %v547_v5 = vadd.s32 %v1290_v60, %v514_v20  ;;  %v516_v6 = vadd.s32 184, %v1278_v53 }
  0xd9   : > { %1103 = vst [vmem:[%s1239_s6 + $0x78] sm:$0xff] %v1087_v15   ;;  %v518_v41 = vadd.s32 200, %v1278_v53  ;;  %vm578_vm5 = vcmp.lt.s32.totalorder %v546_v22, 512  ;;  %v548_v13 = vadd.s32 %v1290_v60, %v515_v62  ;;  %v677_v14 = vmul.f32 %v608_v57, %v608_v57 }
  0xda   : > { %v633_v26 = vadd.f32 %v632_v27, %v602_v17  ;;  %v701_v21 = vadd.f32 %v700_v33, %v670_v31  ;;  %v550_v55 = vadd.s32 %v1290_v60, %v517_v0  ;;  %v609_v10 = vsel %vm577_vm4, %v1288_v59, 0.0 }
  0xdb   : > { %v519_v19 = vadd.s32 208, %v1278_v53  ;;  %vm579_vm6 = vcmp.lt.s32.totalorder %v547_v5, 512  ;;  %v549_v29 = vadd.s32 %v1290_v60, %v516_v6  ;;  %v551_v30 = vadd.s32 %v1290_v60, %v518_v41 }
  0xdc   : > { %v634_v47 = vadd.f32 %v633_v26, %v603_v37  ;;  %v702_v50 = vadd.f32 %v701_v21, %v671_v9  ;;  %v610_v17 = vsel %vm578_vm5, %v1340_v38, 0.0  ;;  %v678_v31 = vmul.f32 %v609_v10, %v609_v10 }
  0xdd   : > { %vm580_vm7 = vcmp.lt.s32.totalorder %v548_v13, 512  ;;  %vm582_vm8 = vcmp.lt.s32.totalorder %v550_v55, 512  ;;  %v552_v34 = vadd.s32 %v1290_v60, %v519_v19  ;;  %v611_v59 = vsel %vm579_vm6, %v1346_v51, 0.0 }
  0xde   : > { %v635_v56 = vadd.f32 %v634_v47, %v604_v44  ;;  %v703_v58 = vadd.f32 %v702_v50, %v672_v46  ;;  %v520_v37 = vadd.s32 216, %v1278_v53  ;;  %v679_v43 = vmul.f32 %v610_v17, %v610_v17 }
  0xdf   : > { %vm581_vm9 = vcmp.lt.s32.totalorder %v549_v29, 512  ;;  %v612_v26 = vsel %vm580_vm7, %v1395_v63, 0.0  ;;  %v521_v21 = vadd.s32 224, %v1278_v53  ;;  %vm583_vm10 = vcmp.lt.s32.totalorder %v551_v30, 512 }
  0xe0   : > { %v704_v35 = vadd.f32 %v703_v58, %v673_v48  ;;  %v636_v28 = vadd.f32 %v635_v56, %v605_v54  ;;  %v680_v44 = vmul.f32 %v611_v59, %v611_v59  ;;  %v614_v46 = vsel %vm582_vm8, %v1257_v39, 0.0 }
  0xe1   : > { %vm584_vm11 = vcmp.lt.s32.totalorder %v552_v34, 512  ;;  %v553_v47 = vadd.s32 %v1290_v60, %v520_v37  ;;  %v613_v51 = vsel %vm581_vm9, %v1401_v11, 0.0  ;;  %v681_v52 = vmul.f32 %v612_v26, %v612_v26 }
  0xe2   : > { %v637_v42 = vadd.f32 %v636_v28, %v606_v18  ;;  %v705_v3 = vadd.f32 %v704_v35, %v674_v61  ;;  %v522_v54 = vadd.s32 232, %v1278_v53  ;;  %v615_v63 = vsel %vm583_vm10, %v1260_v40, 0.0 }
  0xe3   : > { %v554_v56 = vadd.s32 %v1290_v60, %v521_v21  ;;  %v682_v20 = vmul.f32 %v613_v51, %v613_v51  ;;  %v683_v39 = vmul.f32 %v614_v46, %v614_v46  ;;  %v616_v22 = vsel %vm584_vm11, %v1297_v1, 0.0 }
  0xe4   : > { %v638_v7 = vadd.f32 %v637_v42, %v607_v25  ;;  %v706_v8 = vadd.f32 %v705_v3, %v675_v32  ;;  %v523_v25 = vadd.s32 240, %v1278_v53  ;;  %vm585_vm12 = vcmp.lt.s32.totalorder %v553_v47, 512 }
  0xe5   : > { %v555_v28 = vadd.s32 %v1290_v60, %v522_v54  ;;  %v524_v61 = vadd.s32 248, %v1278_v53  ;;  %v684_v62 = vmul.f32 %v615_v63, %v615_v63  ;;  %vm586_vm13 = vcmp.lt.s32.totalorder %v554_v56, 512 }
  0xe6   : > { %v707_v23 = vadd.f32 %v706_v8, %v676_v36  ;;  %v639_v24 = vadd.f32 %v638_v7, %v608_v57  ;;  %v556_v57 = vadd.s32 %v1290_v60, %v523_v25  ;;  %v685_v0 = vmul.f32 %v616_v22, %v616_v22 }
  0xe7   : > { %v617_v42 = vsel %vm585_vm12, %v1304_v4, 0.0  ;;  %vm587_vm14 = vcmp.lt.s32.totalorder %v555_v28, 512  ;;  %v557_v1 = vadd.s32 %v1290_v60, %v524_v61  ;;  %v618_v6 = vsel %vm586_vm13, %v1356_v2, 0.0 }
  0xe8   : > { %v640_v33 = vadd.f32 %v639_v24, %v609_v10  ;;  %v708_v27 = vadd.f32 %v707_v23, %v677_v14  ;;  %v686_v36 = vmul.f32 %v617_v42, %v617_v42  ;;  %vm588_vm15 = vcmp.lt.s32.totalorder %v556_v57, 512 }
  0xe9   : > { %v619_v8 = vsel %vm587_vm14, %v1363_v12, 0.0  ;;  %v687_v13 = vmul.f32 %v618_v6, %v618_v6  ;;  %vm589_vm0 = vcmp.lt.s32.totalorder %v557_v1, 512  ;;  %v620_v4 = vsel %vm588_vm15, %v1406_v16, 0.0 }
  0xea   : > { %v641_v15 = vadd.f32 %v640_v33, %v610_v17  ;;  %v709_v9 = vadd.f32 %v708_v27, %v678_v31  ;;  %v688_v19 = vmul.f32 %v619_v8, %v619_v8  ;;  %v621_v60 = vsel %vm589_vm0, %v1415_v49, 0.0 }
  0xeb   : > { %v689_v29 = vmul.f32 %v620_v4, %v620_v4  ;;  %v690_v31 = vmul.f32 %v621_v60, %v621_v60  ;;  %vm728_vm1 = vcmp.eq.s32.totalorder %v1278_v53, 0 }
  0xec   : > { %v642_v38 = vadd.f32 %v641_v15, %v611_v59  ;;  %v710_v45 = vadd.f32 %v709_v9, %v679_v43 }
  0xee   : > { %v711_v50 = vadd.f32 %v710_v45, %v680_v44  ;;  %v643_v18 = vadd.f32 %v642_v38, %v612_v26 }
  0xf0   : > { %v712_v48 = vadd.f32 %v711_v50, %v681_v52  ;;  %v644_v58 = vadd.f32 %v643_v18, %v613_v51 }
  0xf2   : > { %v645_v35 = vadd.f32 %v644_v58, %v614_v46  ;;  %v713_v11 = vadd.f32 %v712_v48, %v682_v20 }
  0xf4   : > { %v646_v40 = vadd.f32 %v645_v35, %v615_v63  ;;  %v714_v32 = vadd.f32 %v713_v11, %v683_v39 }
  0xf6   : > { %v715_v3 = vadd.f32 %v714_v32, %v684_v62  ;;  %v647_v5 = vadd.f32 %v646_v40, %v616_v22 }
  0xf8   : > { %v648_v41 = vadd.f32 %v647_v5, %v617_v42  ;;  %v716_v7 = vadd.f32 %v715_v3, %v685_v0 }
  0xfa   : > { %v649_v14 = vadd.f32 %v648_v41, %v618_v6  ;;  %v717_v55 = vadd.f32 %v716_v7, %v686_v36 }
  0xfc   : > { %v650_v10 = vadd.f32 %v649_v14, %v619_v8  ;;  %v718_v23 = vadd.f32 %v717_v55, %v687_v13 }
  0xfe   : > { %v719_v2 = vadd.f32 %v718_v23, %v688_v19  ;;  %v651_v24 = vadd.f32 %v650_v10, %v620_v4 }
 0x100   : > { %v720_v30 = vadd.f32 %v719_v2, %v689_v29  ;;  %v652_v17 = vadd.f32 %v651_v24, %v621_v60 }
 0x102   : > { %v653_v12 = vrot.slane %v652_v17, 4  ;;  %v721_v33 = vadd.f32 %v720_v30, %v690_v31 }
 0x104   : > { %v654_v27 = vadd.f32 %v653_v12, %v652_v17  ;;  %v722_v34 = vrot.slane %v721_v33, 4 }
 0x106   : > { %v655_v59 = vrot.slane %v654_v27, 2  ;;  %v723_v37 = vadd.f32 %v722_v34, %v721_v33 }
 0x108   : > { %v656_v16 = vadd.f32 %v655_v59, %v654_v27  ;;  %v724_v43 = vrot.slane %v723_v37, 2 }
 0x10a   : > { %v657_v15 = vrot.slane %v656_v16, 1  ;;  %v725_v9 = vadd.f32 %v724_v43, %v723_v37 }
 0x10c   : > { %v658_v49 = vadd.f32 %v657_v15, %v656_v16  ;;  %v726_v26 = vrot.slane %v725_v9, 1 }
 0x10e   : > { %v727_v21 = vadd.f32 %v726_v26, %v725_v9  ;;  %v729_v38 = vsel %vm728_vm1, %v658_v49, 0.0 }
 0x110   : > { %v731_v44 = vsel %vm730_vm2, %v727_v21, 0.0 }
 0x111   : > { %v732_v45 = vadd.f32 %v731_v44, %v729_v38 }
 0x113   : > { %733 = vst [vmem:[%s211_s11] sm:$0xff] %v732_v45 }
 0x114 PF: > { %s15_s15 = sadd.s32 1, %s1128_s15  }
 0x115   : > { %p12_p5 = scmp.ge.s32.totalorder %s15_s15, 4  }
 0x117   :  { %14 = sbr.rel (!%p12_p5) target bundleno = 1 (0x1), region = 74 }

// kernel: fblock_forward.5
= control target key start
LH: loop header
LB: loop body
LE: loop exit
PB: predicated region body
PF: predicated region fallthrough
CT: control target
= control target key end

     0   :  { %s481_s12 = smov 0   ;;  %s530_s0 = inlined_call_operand.vmem [shape: bf16[128,80], index: 0, kind: input, shape index: {}]   ;;  %s531_s1 = inlined_call_operand.vmem [shape: bf16[80,128], index: 1, kind: input, shape index: {}]   ;;  %s532_s2 = inlined_call_operand.vmem [shape: f32[1,128], index: 2, kind: input, shape index: {}]   ;;  %s533_s3 = inlined_call_operand.vmem [shape: f32[128,128], index: 3, kind: output, shape index: {}]  }
   0x1 LB: > { %s369_s13 = sadd.s32 4294967295, %s459_s12   ;;  %p373_p0 = scmp.ge.s32.totalorder %s459_s12, 1  ;;  %s459_s12 = sphi %s481_s12, %s13_s12  }
   0x2   : > { %p138_p1 = scmp.lt.s32.totalorder %s459_s12, 3 }
   0x4   : > { %p139_p2 = pnand %p373_p0, %p138_p1 }
   0x5   : > { %s374_s16 = sshll.u32 (!%p139_p2), %s369_s13, 3 }
   0x6   : > { %142 = sbr.rel (%p139_p2) target bundleno = 180 (0xb4), region = 32  ;;  %p163_p3 = scmp.lt.s32.totalorder (!%p139_p2), %s374_s16, 15 }
   0xb   : > { %v428_v0 = vld [vmem:[%s531_s1 + $0x20] sm:$0xff]  ;;  %v427_v1 = vld [vmem:[%s531_s1 + $0x18] sm:$0xff]  ;;  %v426_v2 = vld [vmem:[%s531_s1 + $0x10] sm:$0xff]  ;;  %s535_s16 = smov (!%p163_p3, %s374_s16), 15  ;;  %vm247_vm0 = vcmask 654336  }
   0xc   : > { %263 = vmatpush.bf16.msra.mxu0 %v428_v0  ;;  %429 = vmatpush.bf16.msra.mxu1 %v428_v0  ;;  %v425_v3 = vld [vmem:[%s531_s1 + $0x8] sm:$0xff]  ;;  %s375_s23 = sshll.u32 %s535_s16, 2  ;;  %v424_v4 = vld [vmem:[%s531_s1] sm:$0xff]  ;;  %s377_s4 = sshll.u32 %s535_s16, 3 }
   0xd   : > { %430 = vmatpush.bf16.msra.mxu2 %v428_v0  ;;  %431 = vmatpush.bf16.msra.mxu3 %v428_v0  ;;  %s166_s28 = scalar_lea.vmem %s530_s0, %s375_s23  ;;  %v452_v9 = vld [vmem:[%s532_s2] ss:$0 sm:$0xff]  ;;  %s517_s7 = scalar_lea.vmem %s533_s3, %s377_s4 }
   0xe   : > { %v420_v5 = vld [vmem:[%s166_s28] sm:$0xff]  ;;  %v421_v6 = vld [vmem:[%s166_s28 + $0x8] sm:$0xff]  ;;  %v422_v7 = vld [vmem:[%s166_s28 + $0x10] sm:$0xff] }
   0xf   : > { %v423_v8 = vld [vmem:[%s166_s28 + $0x18] sm:$0xff] }
  0x10   : > { %264 = vmatpush.bf16.msra.mxu0 %v427_v1  ;;  %432 = vmatpush.bf16.msra.mxu1 %v427_v1 }
  0x11   : > { %433 = vmatpush.bf16.msra.mxu2 %v427_v1  ;;  %434 = vmatpush.bf16.msra.mxu3 %v427_v1 }
  0x14   : > { %265 = vmatpush.bf16.msra.mxu0 %v426_v2  ;;  %435 = vmatpush.bf16.msra.mxu1 %v426_v2 }
  0x15   : > { %436 = vmatpush.bf16.msra.mxu2 %v426_v2  ;;  %437 = vmatpush.bf16.msra.mxu3 %v426_v2 }
  0x18   : > { %266 = vmatpush.bf16.msra.mxu0 %v425_v3  ;;  %438 = vmatpush.bf16.msra.mxu1 %v425_v3 }
  0x19   : > { %439 = vmatpush.bf16.msra.mxu2 %v425_v3  ;;  %440 = vmatpush.bf16.msra.mxu3 %v425_v3 }
  0x1c   : > { %267 = vmatpush.bf16.msra.mxu0 %v424_v4  ;;  %441 = vmatpush.bf16.msra.mxu1 %v424_v4 }
  0x1d   : > { %442 = vmatpush.bf16.msra.mxu2 %v424_v4  ;;  %443 = vmatpush.bf16.msra.mxu3 %v424_v4 }
  0x1f   : > { %414 = vmatmul.msk.bf16.vlgmr.msra.gmra.mxu0 %vm247_vm0, %v420_v5  ;;  %415 = vmatmul.msk.bf16.vlgmr.msra.gmra.mxu1 %vm247_vm0, %v421_v6 }
  0x20   : > { %416 = vmatmul.msk.bf16.vlgmr.msra.gmra.mxu2 %vm247_vm0, %v422_v7  ;;  %417 = vmatmul.msk.bf16.vlgmr.msra.gmra.mxu3 %vm247_vm0, %v423_v8 }
  0x9c   : > { %v269_v10 = vpop.f32.mrf.mxu0  ;;  %v274_v11 = vpop.f32.mrf.mxu1 }
  0x9d   : > { %v270_v12 = vadd.f32 %v452_v9, %v269_v10  ;;  %v275_v13 = vadd.f32 %v452_v9, %v274_v11 }
  0x9f   : > { %v289_v14 = vmul.f32 0.01, %v270_v12  ;;  %v291_v15 = vmul.f32 0.01, %v275_v13 }
  0xa1   : > { %v297_v16 = vmax.f32 %v270_v12, %v289_v14  ;;  %v299_v17 = vmax.f32 %v275_v13, %v291_v15 }
  0xa3   : > { %305 = vst [vmem:[%s517_s7] sm:$0xff] %v297_v16  ;;  %v279_v18 = vpop.f32.mrf.mxu2  ;;  %v284_v19 = vpop.f32.mrf.mxu3 }
  0xa4   : > { %307 = vst [vmem:[%s517_s7 + $0x10] sm:$0xff] %v299_v17  ;;  %v280_v20 = vadd.f32 %v452_v9, %v279_v18  ;;  %v285_v21 = vadd.f32 %v452_v9, %v284_v19  ;;  %v271_v22 = vpop.f32.mrf.mxu0  ;;  %v276_v23 = vpop.f32.mrf.mxu1 }
  0xa5   : > { %v272_v24 = vadd.f32 %v452_v9, %v271_v22  ;;  %v277_v25 = vadd.f32 %v452_v9, %v276_v23 }
  0xa6   : > { %v293_v26 = vmul.f32 0.01, %v280_v20  ;;  %v295_v27 = vmul.f32 0.01, %v285_v21 }
  0xa7   : > { %v290_v28 = vmul.f32 0.01, %v272_v24  ;;  %v292_v29 = vmul.f32 0.01, %v277_v25 }
  0xa8   : > { %v301_v30 = vmax.f32 %v280_v20, %v293_v26  ;;  %v303_v31 = vmax.f32 %v285_v21, %v295_v27 }
  0xa9   : > { %v298_v32 = vmax.f32 %v272_v24, %v290_v28  ;;  %v300_v33 = vmax.f32 %v277_v25, %v292_v29 }
  0xaa   : > { %309 = vst [vmem:[%s517_s7 + $0x20] sm:$0xff] %v301_v30 }
  0xab   : > { %311 = vst [vmem:[%s517_s7 + $0x30] sm:$0xff] %v303_v31  ;;  %v281_v34 = vpop.f32.mrf.mxu2  ;;  %v286_v35 = vpop.f32.mrf.mxu3 }
  0xac   : > { %306 = vst [vmem:[%s517_s7 + $0x8] sm:$0xff] %v298_v32  ;;  %v282_v36 = vadd.f32 %v452_v9, %v281_v34  ;;  %v287_v37 = vadd.f32 %v452_v9, %v286_v35 }
  0xad   : > { %308 = vst [vmem:[%s517_s7 + $0x18] sm:$0xff] %v300_v33 }
  0xae   : > { %v294_v38 = vmul.f32 0.01, %v282_v36  ;;  %v296_v39 = vmul.f32 0.01, %v287_v37 }
  0xb0   : > { %v302_v40 = vmax.f32 %v282_v36, %v294_v38  ;;  %v304_v41 = vmax.f32 %v287_v37, %v296_v39 }
  0xb2   : > { %310 = vst [vmem:[%s517_s7 + $0x28] sm:$0xff] %v302_v40 }
  0xb3   : > { %312 = vst [vmem:[%s517_s7 + $0x38] sm:$0xff] %v304_v41 }
  0xb4 PF: > { %s13_s12 = sadd.s32 1, %s459_s12  }
  0xb5   : > { %p10_p4 = scmp.ge.s32.totalorder %s13_s12, 4  }
  0xb7   :  { %12 = sbr.rel (!%p10_p4) target bundleno = 1 (0x1), region = 62 }

</bundles_post_ra>
